<compile_context>
chip_gen: v7x
topology: tpu7x:2x2x1
jax: 0.10.0
libtpu: 0.0.40
codegen_flags: <defaults>
</compile_context>

<pallas_src>
import functools

import jax
import jax.numpy as jnp
from jax import lax
from jax.experimental import pallas as pl
from jax.experimental.pallas import tpu as pltpu

LANES = 128

# (Cin, Cout, kernel) for conv1..conv6 (all stride 1, padding 0, no bias)
CONV_CFG = [
    (6, 64, 7),      # conv1
    (64, 128, 5),    # conv2
    (128, 256, 5),   # conv3
    (256, 256, 3),   # conv3_1
    (256, 512, 3),   # conv4
    (512, 512, 3),   # conv4_1
    (512, 512, 3),   # conv5
    (512, 512, 3),   # conv5_1
    (512, 1024, 3),  # conv6
]


def _round_up(x, m):
    return (x + m - 1) // m * m


def _vmem_limit_bytes(tile_bytes):
    """Generation-aware VMEM budget: tile footprint + headroom, capped at
    5/8 of the physical per-core VMEM (40 MiB on v7x, 80 MiB on v5e/v6e)."""
    try:
        cap = int(getattr(pltpu.get_tpu_info(), "vmem_capacity_bytes", 64 << 20))
    except Exception:
        cap = 64 << 20  # conservative fallback: v7x per-TensorCore VMEM
    budget = tile_bytes + (8 << 20)
    return int(min(max(budget, 32 << 20), (cap * 5) // 8))


# ----------------------------------------------------------------------------
# Pallas kernel 1: (im2col-matmul) + folded BatchNorm + ReLU
# ----------------------------------------------------------------------------
def _matmul_bn_act_kernel(a_ref, w_ref, ss_ref, o_ref):
    acc = jnp.dot(a_ref[...], w_ref[...], preferred_element_type=jnp.float32)
    y = acc * ss_ref[0:1, :] + ss_ref[1:2, :]              # folded BN (f32)
    o_ref[...] = jnp.maximum(y, 0.0).astype(o_ref.dtype)   # LeakyReLU(0) == ReLU


def matmul_bn_act(a, w, ss, out_dtype=jnp.bfloat16):
    """a: (M, K) bf16 patches, w: (K, Np) bf16, ss: (2, Np) f32 -> (M, Np)."""
    M, K = a.shape
    Kw, Np = w.shape
    assert K == Kw and Np % LANES == 0 and K % 8 == 0

    # bf16 packs 16 rows per sublane group -> tm multiple of 16, VMEM-bounded.
    tm = min(256, _round_up(M, 16))
    Mp = _round_up(M, tm)
    if Mp > M:
        a = jnp.pad(a, ((0, Mp - M), (0, 0)))

    # 256-wide output tiles fill the 256-wide MXU (v6e/v7x) but only when they
    # still leave >=2 N tiles so both v7x TensorCores get work; otherwise 128.
    tn = 256 if (Np % 256 == 0 and Np >= 512) else 128
    num_m, num_n = Mp // tm, Np // tn

    # Grid ordering: keep the operand with the larger total re-stream cost
    # resident across the inner axis (its block index stays constant between
    # consecutive grid steps, so it is DMA'd from HBM exactly once).
    a_bytes = Mp * K * a.dtype.itemsize
    w_bytes = K * Np * w.dtype.itemsize
    if a_bytes + num_m * w_bytes <= w_bytes + num_n * a_bytes:
        grid = (num_m, num_n)            # A fetched once; W refetched per M tile
        a_map = lambda i, j: (i, 0)
        w_map = lambda i, j: (0, j)
        o_map = lambda i, j: (i, j)
    else:
        grid = (num_n, num_m)            # W fetched once; A refetched per N tile
        a_map = lambda j, i: (i, 0)
        w_map = lambda j, i: (0, j)
        o_map = lambda j, i: (i, j)

    in_b = a.dtype.itemsize
    out_b = jnp.dtype(out_dtype).itemsize
    tile_bytes = (2 * (tm * K * in_b + K * tn * in_b + 2 * tn * 4 + tm * tn * out_b)
                  + tm * tn * 4)

    out = pl.pallas_call(
        _matmul_bn_act_kernel,
        out_shape=jax.ShapeDtypeStruct((Mp, Np), out_dtype),
        grid_spec=pltpu.PrefetchScalarGridSpec(
            num_scalar_prefetch=0,
            grid=grid,
            in_specs=[
                pl.BlockSpec((tm, K), a_map),
                pl.BlockSpec((K, tn), w_map),
                pl.BlockSpec((2, tn), w_map),   # packed (scale, shift), follows W
            ],
            out_specs=pl.BlockSpec((tm, tn), o_map),
        ),
        compiler_params=pltpu.CompilerParams(
            dimension_semantics=("parallel", "parallel"),
            vmem_limit_bytes=_vmem_limit_bytes(tile_bytes),
        ),
    )(a, w, ss)
    return out[:M] if Mp > M else out


# ----------------------------------------------------------------------------
# Pallas kernel 2: K-tiled bf16 matmul + bias (hoisted LSTM input projection)
# ----------------------------------------------------------------------------
def _proj_kernel(x_ref, w_ref, b_ref, o_ref, acc_ref):
    kk = pl.program_id(0)

    @pl.when(kk == 0)
    def _():
        acc_ref[...] = jnp.zeros_like(acc_ref)

    acc_ref[...] += jnp.dot(x_ref[...], w_ref[...],
                            preferred_element_type=jnp.float32)

    @pl.when(kk == pl.num_programs(0) - 1)
    def _():
        o_ref[...] = acc_ref[...] + b_ref[...]


def matmul_bias(x, w, b):
    """x: (M, D) bf16, w: (D, G) bf16, b: (1, G) f32 -> (M, G) f32."""
    M, D = x.shape
    Dw, G = w.shape
    assert D == Dw and D % LANES == 0 and G % LANES == 0
    Mp = _round_up(M, 16)
    if Mp > M:
        x = jnp.pad(x, ((0, Mp - M), (0, 0)))
    tk = 512 if D % 512 == 0 else (256 if D % 256 == 0 else 128)
    num_k = D // tk
    tile_bytes = 2 * (Mp * tk * 2 + tk * G * 2 + G * 4 + Mp * G * 4) + Mp * G * 4

    out = pl.pallas_call(
        _proj_kernel,
        out_shape=jax.ShapeDtypeStruct((Mp, G), jnp.float32),
        grid_spec=pltpu.PrefetchScalarGridSpec(
            num_scalar_prefetch=0,
            grid=(num_k,),
            in_specs=[
                pl.BlockSpec((Mp, tk), lambda k: (0, k)),
                pl.BlockSpec((tk, G), lambda k: (k, 0)),
                pl.BlockSpec((1, G), lambda k: (0, 0)),
            ],
            out_specs=pl.BlockSpec((Mp, G), lambda k: (0, 0)),
            scratch_shapes=[pltpu.VMEM((Mp, G), jnp.float32)],
        ),
        compiler_params=pltpu.CompilerParams(
            dimension_semantics=("arbitrary",),
            vmem_limit_bytes=_vmem_limit_bytes(tile_bytes),
        ),
    )(x, w, b)
    return out[:M] if Mp > M else out


# ----------------------------------------------------------------------------
# Pallas kernel 3: 2-layer LSTM recurrence + Linear head (gate dim padded)
# ----------------------------------------------------------------------------
def _lstm_rec_kernel(xp_ref, whh0_ref, wih1_ref, whh1_ref, b1_ref,
                     wlin_ref, blin_ref, o_ref, *, hidden):
    T, B, _ = xp_ref.shape
    H = hidden

    whh0 = whh0_ref[...]
    wih1 = wih1_ref[...]
    whh1 = whh1_ref[...]
    b1 = b1_ref[...]
    wlin = wlin_ref[...]
    blin = blin_ref[...]

    def cell(pre, h, c, whh):
        # One fused-gate matmul per layer per step (PyTorch gate order i,f,g,o).
        g = pre + jnp.dot(h, whh, preferred_element_type=jnp.float32)
        i_g = jax.nn.sigmoid(g[:, 0:H])
        f_g = jax.nn.sigmoid(g[:, H:2 * H])
        g_g = jnp.tanh(g[:, 2 * H:3 * H])
        o_g = jax.nn.sigmoid(g[:, 3 * H:4 * H])
        c_new = f_g * c + i_g * g_g
        return o_g * jnp.tanh(c_new), c_new

    def step(t, carry):
        h0, c0, h1, c1 = carry
        h0, c0 = cell(xp_ref[t], h0, c0, whh0)
        pre1 = jnp.dot(h0, wih1, preferred_element_type=jnp.float32) + b1
        h1, c1 = cell(pre1, h1, c1, whh1)
        # 128-lane-padded store (real output lives in column 0).
        o_ref[t] = jnp.dot(h1, wlin, preferred_element_type=jnp.float32) + blin
        return (h0, c0, h1, c1)

    z = jnp.zeros((B, H), jnp.float32)
    lax.fori_loop(0, T, step, (z, z, z, z), unroll=True)


def lstm_head(feats, lstm_pad, hidden):
    """feats: (B, T, D) (batch_first, like torch) -> (B, T, 1) f32."""
    B, T, D = feats.shape
    wih0_p, b0_p, whh0_p, wih1_p, whh1_p, b1_p, wlin_p, blin_p = lstm_pad
    Dp = wih0_p.shape[0]

    x_tb = jnp.transpose(feats, (1, 0, 2)).reshape(T * B, D).astype(jnp.bfloat16)
    if Dp > D:
        x_tb = jnp.pad(x_tb, ((0, 0), (0, Dp - D)))

    # Hoisted layer-0 input projection: one K-tiled (T*B, D) @ (D, 4H_pad) matmul.
    xp0 = matmul_bias(x_tb, wih0_p, b0_p).reshape(T, B, -1)

    out = pl.pallas_call(
        functools.partial(_lstm_rec_kernel, hidden=hidden),
        out_shape=jax.ShapeDtypeStruct((T, B, LANES), jnp.float32),
    )(xp0, whh0_p, wih1_p, whh1_p, b1_p, wlin_p, blin_p)
    return jnp.transpose(out[:, :, :1], (1, 0, 2))


# ----------------------------------------------------------------------------
# Glue: im2col, parameters, forward
# ----------------------------------------------------------------------------
def im2col(x, k):
    """x: (N, H, W, C) NHWC -> (N*Ho*Wo, k*k*C), valid padding, stride 1."""
    N, H, W, C = x.shape
    Ho, Wo = H - k + 1, W - k + 1
    cols = [x[:, dh:dh + Ho, dw:dw + Wo, :] for dh in range(k) for dw in range(k)]
    p = jnp.stack(cols, axis=3)                   # (N, Ho, Wo, k*k, C)
    return p.reshape(N * Ho * Wo, k * k * C), (N, Ho, Wo)


def init_params(key, image_w, image_h, hidden=3):
    params = {"convs": []}
    cin_p = 8                                   # network input padded 6 -> 8 channels
    for (cin, cout, k) in CONV_CFG:
        key, k1, k2, k3 = jax.random.split(key, 4)
        cout_p = _round_up(cout, LANES)
        # PyTorch Conv2d weight layout (Cout, Cin, kh, kw) -> (kh, kw, Cin, Cout),
        # built with Cin already zero-padded so channel padding carries through.
        w_oihw = jax.random.normal(k1, (cout, cin, k, k), jnp.float32)
        w_oihw = w_oihw * (2.0 / (cin * k * k)) ** 0.5
        w_khwc = jnp.transpose(w_oihw, (2, 3, 1, 0))
        w_full = jnp.zeros((k, k, cin_p, cout_p), jnp.float32)
        w_full = w_full.at[:, :, :cin, :cout].set(w_khwc)
        w_mat = w_full.reshape(k * k * cin_p, cout_p).astype(jnp.bfloat16)

        gamma = 1.0 + 0.05 * jax.random.normal(k2, (cout,), jnp.float32)
        beta = 0.05 * jax.random.normal(k3, (cout,), jnp.float32)
        running_mean = jnp.zeros((cout,), jnp.float32)
        running_var = jnp.ones((cout,), jnp.float32)
        scale = gamma / jnp.sqrt(running_var + 1e-5)
        shift = beta - running_mean * scale
        ss = jnp.zeros((2, cout_p), jnp.float32)    # padded channels stay exactly 0
        ss = ss.at[0, :cout].set(scale)
        ss = ss.at[1, :cout].set(shift)
        params["convs"].append((w_mat, ss, k))
        cin_p = cout_p

    # torch dummy in __init__ is zeros(1, 6, image_w, image_h)
    d0, d1 = image_w, image_h
    for (_, _, k) in CONV_CFG:
        d0, d1 = d0 - (k - 1), d1 - (k - 1)
    rnn_input = CONV_CFG[-1][1] * d0 * d1

    H = hidden
    G = _round_up(4 * H, LANES)
    bound = 1.0 / (H ** 0.5)

    def uniform(k_, shape):
        return jax.random.uniform(k_, shape, jnp.float32, -bound, bound)

    key, k1, k2, k3, k4 = jax.random.split(key, 5)
    wih0 = uniform(k1, (rnn_input, 4 * H))
    whh0 = uniform(k2, (H, 4 * H))
    b0 = uniform(k3, (1, 4 * H)) + uniform(k4, (1, 4 * H))   # b_ih + b_hh
    key, k1, k2, k3, k4 = jax.random.split(key, 5)
    wih1 = uniform(k1, (H, 4 * H))
    whh1 = uniform(k2, (H, 4 * H))
    b1 = uniform(k3, (1, 4 * H)) + uniform(k4, (1, 4 * H))
    key, k1, k2 = jax.random.split(key, 3)
    wlin = uniform(k1, (H, 1))
    blin = uniform(k2, (1, 1))

    Dp = _round_up(rnn_input, LANES)

    def padc(a, rows, cols):
        out = jnp.zeros((rows, cols), a.dtype)
        return out.at[:a.shape[0], :a.shape[1]].set(a)

    params["lstm_raw"] = (wih0, whh0, b0, wih1, whh1, b1, wlin, blin)
    params["lstm_pad"] = (
        padc(wih0, Dp, G).astype(jnp.bfloat16),   # bf16 MXU operand for projection
        padc(b0, 1, G),
        padc(whh0, H, G),
        padc(wih1, H, G),
        padc(whh1, H, G),
        padc(b1, 1, G),
        padc(wlin, H, LANES),                     # Linear head, 128-lane padded
        padc(blin, 1, LANES),
    )
    return params, rnn_input


def deepvo_forward(params, x_nchw, seq_len, hidden):
    B = x_nchw.shape[0]
    y = jnp.transpose(x_nchw, (0, 2, 3, 1)).astype(jnp.bfloat16)    # NCHW -> NHWC
    y = jnp.pad(y, ((0, 0), (0, 0), (0, 0), (0, 8 - y.shape[-1])))  # 6 -> 8 channels
    for (w_mat, ss, k) in params["convs"]:
        a, (N, Ho, Wo) = im2col(y, k)
        z = matmul_bn_act(a, w_mat, ss)            # (M, Cout_pad) bf16, BN+ReLU fused
        y = z.reshape(N, Ho, Wo, -1)               # padded channels remain 0
    # conv6's Cout (1024) is already lane-aligned, so no channel slice is needed.
    y = jnp.transpose(y, (0, 3, 1, 2))             # NCHW flatten order (torch .view)
    feats = y.reshape(B, seq_len, -1)
    return lstm_head(feats, params["lstm_pad"], hidden)


# Pure-JAX reference (identical math, no Pallas) used as a smoke check.
def reference_forward(params, x_nchw, seq_len, hidden):
    B = x_nchw.shape[0]
    y = jnp.transpose(x_nchw, (0, 2, 3, 1)).astype(jnp.bfloat16)
    y = jnp.pad(y, ((0, 0), (0, 0), (0, 0), (0, 8 - y.shape[-1])))
    for (w_mat, ss, k) in params["convs"]:
        a, (N, Ho, Wo) = im2col(y, k)
        z = jnp.dot(a, w_mat, preferred_element_type=jnp.float32)
        z = jnp.maximum(z * ss[0:1, :] + ss[1:2, :], 0.0).astype(jnp.bfloat16)
        y = z.reshape(N, Ho, Wo, -1)
    y = jnp.transpose(y, (0, 3, 1, 2))
    x = y.reshape(B, seq_len, -1)

    wih0, whh0, b0, wih1, whh1, b1, wlin, blin = params["lstm_raw"]
    H = hidden
    xp = jnp.dot(x.astype(jnp.bfloat16), wih0.astype(jnp.bfloat16),
                 preferred_element_type=jnp.float32) + b0   # mirrors bf16 projection

    def cell(pre, h, c, whh):
        g = pre + h @ whh
        i_, f_ = jax.nn.sigmoid(g[:, :H]), jax.nn.sigmoid(g[:, H:2 * H])
        g_, o_ = jnp.tanh(g[:, 2 * H:3 * H]), jax.nn.sigmoid(g[:, 3 * H:])
        c = f_ * c + i_ * g_
        return o_ * jnp.tanh(c), c

    h0 = c0 = h1 = c1 = jnp.zeros((B, H), jnp.float32)
    outs = []
    for t in range(seq_len):
        h0, c0 = cell(xp[:, t, :], h0, c0, whh0)
        h1, c1 = cell(h0 @ wih1 + b1, h1, c1, whh1)
        outs.append(h1 @ wlin + blin)
    return jnp.stack(outs, axis=1)


if __name__ == "__main__":
    # __init__ dummy size: 27x27 -> conv stack -> 1x1x1024 -> LSTM input = 1024
    IMAGE_W = IMAGE_H = 27
    SEQ_LEN = 2
    BATCH = 2
    HIDDEN = 3
    # forward input spatial 28x27 -> conv features 2x1x1024 -> 2048 = seq_len*1024,
    # so x.view(batch, seq_len, -1) yields the LSTM's expected input size.
    X_H, X_W = 28, 27

    key = jax.random.PRNGKey(0)
    key, pkey, xkey = jax.random.split(key, 3)
    params, rnn_input = init_params(pkey, IMAGE_W, IMAGE_H, hidden=HIDDEN)

    x = jax.random.normal(xkey, (BATCH, 6, X_H, X_W), jnp.float32)

    out = deepvo_forward(params, x, SEQ_LEN, HIDDEN)
    out = jax.block_until_ready(out)

    assert out.shape == (BATCH, SEQ_LEN, 1), out.shape
    ref = reference_forward(params, x, SEQ_LEN, HIDDEN)
    assert bool(jnp.allclose(out, ref, rtol=7.5e-2, atol=5e-3)), (out, ref)

    print("KERNEL_OK")
</pallas_src>

<mosaic_0001>
module attributes {stable_mosaic.version = 11 : i64} {
  func.func @_matmul_bn_act_kernel(%arg0: i32, %arg1: i32, %arg2: memref<256x392xbf16, #tpu.memory_space<vmem>>, %arg3: memref<392x128xbf16, #tpu.memory_space<vmem>>, %arg4: memref<2x128xf32, #tpu.memory_space<vmem>>, %arg5: memref<256x128xbf16, #tpu.memory_space<vmem>>) attributes {dimension_semantics = [#tpu.dimension_semantics<parallel>, #tpu.dimension_semantics<parallel>], iteration_bounds = array<i64: 1, 4>, scalar_prefetch = 0 : i64, scratch_operands = 0 : i64, tpu.core_type = #tpu.core_type<tc>, window_params = [{transform_indices = @transform_0, window_bounds = array<i64: 256, 392>}, {transform_indices = @transform_1, window_bounds = array<i64: 392, 128>}, {transform_indices = @transform_2, window_bounds = array<i64: 2, 128>}, {transform_indices = @transform_3, window_bounds = array<i64: 256, 128>}]} {
    %c0 = arith.constant 0 : index
    %c0_0 = arith.constant 0 : index
    %0 = vector.load %arg2[%c0, %c0_0] : memref<256x392xbf16, #tpu.memory_space<vmem>>, vector<256x392xbf16>
    %c0_1 = arith.constant 0 : index
    %c0_2 = arith.constant 0 : index
    %1 = vector.load %arg3[%c0_1, %c0_2] : memref<392x128xbf16, #tpu.memory_space<vmem>>, vector<392x128xbf16>
    %cst = arith.constant dense<0.000000e+00> : vector<256x128xf32>
    %2 = tpu.matmul %0, %1, %cst {dimension_numbers = #tpu.dot_dimension_numbers<[1], [0], [0], [1], [0, 0, 1, 1], [], []>} : vector<256x392xbf16>, vector<392x128xbf16>, vector<256x128xf32> -> vector<256x128xf32>
    %c0_3 = arith.constant 0 : index
    %c0_4 = arith.constant 0 : index
    %3 = vector.load %arg4[%c0_3, %c0_4] : memref<2x128xf32, #tpu.memory_space<vmem>>, vector<1x128xf32>
    %4 = vector.broadcast %3 : vector<1x128xf32> to vector<256x128xf32>
    %5 = arith.mulf %2, %4 : vector<256x128xf32>
    %c1 = arith.constant 1 : index
    %c0_5 = arith.constant 0 : index
    %6 = vector.load %arg4[%c1, %c0_5] : memref<2x128xf32, #tpu.memory_space<vmem>>, vector<1x128xf32>
    %7 = vector.broadcast %6 : vector<1x128xf32> to vector<256x128xf32>
    %8 = arith.addf %5, %7 : vector<256x128xf32>
    %cst_6 = arith.constant 0.000000e+00 : f32
    %9 = vector.broadcast %cst_6 : f32 to vector<256x128xf32>
    %10 = arith.maximumf %8, %9 : vector<256x128xf32>
    %11 = arith.truncf %10 : vector<256x128xf32> to vector<256x128xbf16>
    %c0_7 = arith.constant 0 : index
    %c0_8 = arith.constant 0 : index
    %12 = vector.load %arg5[%c0_7, %c0_8] : memref<256x128xbf16, #tpu.memory_space<vmem>>, vector<256x128xbf16>
    tpu.vector_store %arg5[%c0_7, %c0_8], %11 {strides = array<i32>} : memref<256x128xbf16, #tpu.memory_space<vmem>>, vector<256x128xbf16>,
    return
  }
  func.func @transform_0(%arg0: i32, %arg1: i32) -> (i32, i32) {
    %c0_i32 = arith.constant 0 : i32
    %c0_i32_0 = arith.constant 0 : i32
    return %arg1, %c0_i32 : i32, i32
  }
  func.func @transform_1(%arg0: i32, %arg1: i32) -> (i32, i32) {
    %c0_i32 = arith.constant 0 : i32
    %c0_i32_0 = arith.constant 0 : i32
    return %c0_i32, %arg0 : i32, i32
  }
  func.func @transform_2(%arg0: i32, %arg1: i32) -> (i32, i32) {
    %c0_i32 = arith.constant 0 : i32
    %c0_i32_0 = arith.constant 0 : i32
    return %c0_i32, %arg0 : i32, i32
  }
  func.func @transform_3(%arg0: i32, %arg1: i32) -> (i32, i32) {
    %c0_i32 = arith.constant 0 : i32
    return %arg1, %arg0 : i32, i32
  }
}

</mosaic_0001>

<bundles_post_ra>
// kernel: tpu_custom_call.1
= control target key start
LH: loop header
LB: loop body
LE: loop exit
PB: predicated region body
PF: predicated region fallthrough
CT: control target
= control target key end

     0   :  { %8 = vsyncpa [#allocation3], 0  ;;  %s2602_s0 = inlined_call_operand.vmem [shape: bf16[1024,392], index: 0, kind: input, shape index: {}]   ;;  %s2603_s1 = inlined_call_operand.vmem [shape: bf16[392,128], index: 1, kind: input, shape index: {}]   ;;  %s2604_s2 = inlined_call_operand.vmem [shape: f32[2,128], index: 2, kind: input, shape index: {}]   ;;  %s2605_s3 = inlined_call_operand.hbm [shape: bf16[1024,128], index: 3, kind: output, shape index: {}]  }
   0x1   :  { %10 = vsyncpa [#allocation3 + $0x1], 0  ;;  %s2225_s12 = smov 0   ;;  %s2227_s13 = smov 0  }
   0x2   :  { %s2229_s14 = smov 0   ;;  %s2231_s15 = smov 0  }
   0x3   :  { %s2233_s16 = smov 0   ;;  %s2235_s17 = smov 0  }
   0x4 LB: > { %s1546_s18 = sadd.s32 4294967295, %s2199_s17   ;;  %s1547_s19 = sadd.s32 4294967294, %s2199_s17   ;;  %s2199_s17 = sphi %s2235_s17, %s16_s17   ;;  %s2195_s16 = sphi %s2233_s16, %s2612_s16   ;;  %s2191_s15 = sphi %s2231_s15, %s2611_s15   ;;  %s2187_s14 = sphi %s2229_s14, %s2610_s14   ;;  %s2183_s13 = sphi %s2227_s13, %s2609_s13   ;;  %s2179_s12 = sphi %s2225_s12, %s2608_s12  }
   0x5   : > { %s25_s20 = sadd.s32 1, %s2195_s16  ;;  %s115_s21 = sadd.s32 1, %s2187_s14 }
   0x6   : > { %p26_p0 = scmp.ge.s32.totalorder %s25_s20, 4  ;;  %p125_p1 = scmp.ne.s32.totalorder %s2187_s14, %s2183_s13 }
   0x7   : > { %p126_p2 = scmp.eq.s32.totalorder %s1546_s18, 3  ;;  %p131_p3 = scmp.ne.s32.totalorder %s2183_s13, %s2179_s12 }
   0x8   : > { %s2614_s20 = smov (%p26_p0, %s25_s20), 0  ;;  %p132_p5 = scmp.eq.s32.totalorder %s1547_s19, 3 }
   0x9   : > { %p2265_p4 = por %p126_p2, %p125_p1  ;;  %s110_s23 = ssub.s32 %s2195_s16, %s2614_s20 }
   0xa   : > { %p1552_p6 = scmp.ge.s32.totalorder %s2199_s17, 1  ;;  %p113_p7 = scmp.eq.s32.totalorder %s110_s23, 0 }
   0xb   : > { %p2272_p8 = por %p132_p5, %p131_p3  ;;  %p174_p9 = scmp.lt.s32.totalorder %s2199_s17, 5 }
   0xc   : > { %s2278_s25 = scalar_select %p113_p7, %s2187_s14, %s115_s21  }
   0xd   : > { %p175_p10 = pnand %p1552_p6, %p174_p9 }
   0xe   : > { %v2000_v0 = vld [vmem:[%s2603_s1 + $0x40] sm:$0xff] (!%p175_p10)   ;;  %v2201_v1 = vmov (!%p175_p10), 0   ;;  %v2003_v4 = vld [vmem:[%s2603_s1 + $0x48] sm:$0xff] (!%p175_p10)   ;;  %v2006_v7 = vld [vmem:[%s2603_s1 + $0x50] sm:$0xff] (!%p175_p10)   ;;  %s1554_s27 = sshll.u32 (!%p175_p10), %s2191_s15, 5  ;;  %vm788_vm0 = vcmask (!%p175_p10), 64512  }
   0xf   : > { %178 = sbr.rel (%p175_p10) target bundleno = 410 (0x19a), region = 32  ;;  %1002 = vmatprep.subr.bf16.mxu1 (!%p175_p10), %v2201_v1  ;;  %v2001_v2 = vld [vmem:[%s2603_s1 + $0x80] sm:$0xff] (!%p175_p10)   ;;  %1830 = vmatprep.subr.bf16.mxu0 (!%p175_p10), %v2000_v0  ;;  %v2004_v5 = vld [vmem:[%s2603_s1 + $0x88] sm:$0xff] (!%p175_p10)   ;;  %v2007_v8 = vld [vmem:[%s2603_s1 + $0x90] sm:$0xff] (!%p175_p10)   ;;  %p208_p11 = scmp.lt.s32.totalorder (!%p175_p10), %s1554_s27, 127  ;;  %vm837_vm1 = vcmask (!%p175_p10), 1043456  }
  0x10   : > { %v2002_v3 = vld [vmem:[%s2603_s1] sm:$0xff] (!%p175_p10)   ;;  %1003 = vmatpush1.bf16.msra.mxu1 (!%p175_p10), %v2001_v2  ;;  %v2005_v6 = vld [vmem:[%s2603_s1 + $0x8] sm:$0xff] (!%p175_p10)   ;;  %v2008_v9 = vld [vmem:[%s2603_s1 + $0x10] sm:$0xff] (!%p175_p10)   ;;  %s1734_s10 = sshll.u32 (!%p175_p10), %s2191_s15, 11  ;;  %s2202_s15 = smov (!%p175_p10), [#allocation2]  }
  0x11   : > { %1831 = vmatpush3.bf16.msra.mxu0 (!%p175_p10), %v2002_v3  ;;  %1004 = vmatprep.subr.bf16.mxu1 (!%p175_p10), %v2201_v1  ;;  %v2009_v10 = vld [vmem:[%s2603_s1 + $0x58] sm:$0xff] (!%p175_p10)   ;;  %v2012_v13 = vld [vmem:[%s2603_s1 + $0x60] sm:$0xff] (!%p175_p10)   ;;  %v2015_v16 = vld [vmem:[%s2603_s1 + $0x68] sm:$0xff] (!%p175_p10)   ;;  %s2549_s21 = scalar_lea.hbm (!%p175_p10), %s2605_s3, %s1734_s10 }
  0x12   : > { %1832 = vmatprep.subr.bf16.mxu0 (!%p175_p10), %v2003_v4  ;;  %v2010_v11 = vld [vmem:[%s2603_s1 + $0x98] sm:$0xff] (!%p175_p10)   ;;  %v2013_v14 = vld [vmem:[%s2603_s1 + $0xa0] sm:$0xff] (!%p175_p10)   ;;  %v2016_v17 = vld [vmem:[%s2603_s1 + $0xa8] sm:$0xff] (!%p175_p10)  }
  0x13   : > { %v2011_v12 = vld [vmem:[%s2603_s1 + $0x18] sm:$0xff] (!%p175_p10)   ;;  %v2014_v15 = vld [vmem:[%s2603_s1 + $0x20] sm:$0xff] (!%p175_p10)   ;;  %v2017_v18 = vld [vmem:[%s2603_s1 + $0x28] sm:$0xff] (!%p175_p10)  }
  0x14   : > { %1005 = vmatpush1.bf16.msra.mxu1 (!%p175_p10), %v2004_v5  ;;  %v2018_v19 = vld [vmem:[%s2603_s1 + $0x70] sm:$0xff] (!%p175_p10)   ;;  %v2021_v22 = vld [vmem:[%s2603_s1 + $0x78] sm:$0xff] (!%p175_p10)   ;;  %v2027_v27 = vld [vmem:[%s2603_s1 + $0xc0] ss:$0 sps:$4 sm:$0xff] (!%p175_p10)  }
  0x15   : > { %1833 = vmatpush3.bf16.msra.mxu0 (!%p175_p10), %v2005_v6  ;;  %1006 = vmatprep.subr.bf16.mxu1 (!%p175_p10), %v2201_v1  ;;  %v2019_v20 = vld [vmem:[%s2603_s1 + $0xb0] sm:$0xff] (!%p175_p10)   ;;  %v2022_v24 = vld [vmem:[%s2603_s1 + $0xb8] sm:$0xff] (!%p175_p10)   ;;  %v839_v29 = vsel (!%p175_p10), %vm837_vm1, %v2027_v27, 0 }
  0x16   : > { %1834 = vmatprep.subr.bf16.mxu0 %v2006_v7  ;;  %s2616_s27 = smov (!%p208_p11, %s1554_s27), 127  ;;  %v2020_v21 = vld [vmem:[%s2603_s1 + $0x30] sm:$0xff]   ;;  %v2023_v26 = vld [vmem:[%s2603_s1 + $0x38] sm:$0xff]  }
  0x17   : > { %s1701_s28 = sshll.u32 %s2616_s27, 4 }
  0x18   : > { %1007 = vmatpush1.bf16.msra.mxu1 %v2007_v8  ;;  %s2347_s8 = scalar_lea.vmem %s2602_s0, %s1701_s28  ;;  %s2125_s28 = sshll.u32 %s2202_s15, 4  ;;  %s2126_s28 = int_to_ptr.vmem [resolvable:$false] %s2125_s28 }
  0x19   : > { %1835 = vmatpush3.bf16.msra.mxu0 %v2008_v9  ;;  %1008 = vmatprep.subr.bf16.mxu1 %v2201_v1  ;;  %v2026_v23 = vld [vmem:[%s2347_s8 + $0x4] ss:$16 sps:$4 sm:$0xff]   ;;  %v2030_v25 = vld [vmem:[%s2347_s8 + $0xc] ss:$16 sps:$4 sm:$0xff]   ;;  %v2024_v28 = vld [vmem:[%s2347_s8] ss:$16 sps:$4 sm:$0xff]  }
  0x1a   : > { %1836 = vmatprep.subr.bf16.mxu0 %v2009_v10  ;;  %873 = vmatprep.mubr.bf16.mxu0 %v2026_v23  ;;  %v2031_v30 = vld [vmem:[%s2347_s8 + $0x24] ss:$16 sps:$4 sm:$0xff]   ;;  %v2028_v31 = vld [vmem:[%s2347_s8 + $0x8] ss:$16 sps:$4 sm:$0xff]   ;;  %v2034_v32 = vld [vmem:[%s2347_s8 + $0x2c] ss:$16 sps:$4 sm:$0xff]  }
  0x1b   : > { %1646 = vmatprep.mubr.msk.bf16.mxu1 %vm788_vm0, %v2030_v25  ;;  %v2033_v33 = vld [vmem:[%s2347_s8 + $0x20] ss:$16 sps:$4 sm:$0xff]   ;;  %v2037_v34 = vld [vmem:[%s2347_s8 + $0x44] ss:$16 sps:$4 sm:$0xff]   ;;  %v2036_v35 = vld [vmem:[%s2347_s8 + $0x28] ss:$16 sps:$4 sm:$0xff]  }
  0x1c   : > { %1009 = vmatpush1.bf16.msra.mxu1 %v2010_v11  ;;  %v2040_v36 = vld [vmem:[%s2347_s8 + $0x4c] ss:$16 sps:$4 sm:$0xff]   ;;  %v2039_v37 = vld [vmem:[%s2347_s8 + $0x40] ss:$16 sps:$4 sm:$0xff]   ;;  %v2043_v38 = vld [vmem:[%s2347_s8 + $0x64] ss:$16 sps:$4 sm:$0xff]  }
  0x1d   : > { %1837 = vmatpush3.bf16.msra.mxu0 %v2011_v12  ;;  %1010 = vmatprep.subr.bf16.mxu1 %v2201_v1  ;;  %v2042_v39 = vld [vmem:[%s2347_s8 + $0x48] ss:$16 sps:$4 sm:$0xff]   ;;  %v2046_v40 = vld [vmem:[%s2347_s8 + $0x6c] ss:$16 sps:$4 sm:$0xff]   ;;  %v2045_v41 = vld [vmem:[%s2347_s8 + $0x60] ss:$16 sps:$4 sm:$0xff]  }
  0x1e   : > { %1838 = vmatprep.subr.bf16.mxu0 %v2012_v13  ;;  %v2049_v42 = vld [vmem:[%s2347_s8 + $0x84] ss:$16 sps:$4 sm:$0xff]   ;;  %v2048_v43 = vld [vmem:[%s2347_s8 + $0x68] ss:$16 sps:$4 sm:$0xff]   ;;  %v2052_v44 = vld [vmem:[%s2347_s8 + $0x8c] ss:$16 sps:$4 sm:$0xff]  }
  0x1f   : > { %v2051_v45 = vld [vmem:[%s2347_s8 + $0x80] ss:$16 sps:$4 sm:$0xff]   ;;  %v2055_v46 = vld [vmem:[%s2347_s8 + $0xa4] ss:$16 sps:$4 sm:$0xff]   ;;  %v2054_v47 = vld [vmem:[%s2347_s8 + $0x88] ss:$16 sps:$4 sm:$0xff]  }
  0x20   : > { %1011 = vmatpush1.bf16.msra.mxu1 %v2013_v14  ;;  %v2058_v48 = vld [vmem:[%s2347_s8 + $0xac] ss:$16 sps:$4 sm:$0xff]   ;;  %v2057_v49 = vld [vmem:[%s2347_s8 + $0xa0] ss:$16 sps:$4 sm:$0xff]   ;;  %v2061_v50 = vld [vmem:[%s2347_s8 + $0xc4] ss:$16 sps:$4 sm:$0xff]  }
  0x21   : > { %1839 = vmatpush3.bf16.msra.mxu0 %v2014_v15  ;;  %1012 = vmatprep.subr.bf16.mxu1 %v2201_v1  ;;  %v2060_v51 = vld [vmem:[%s2347_s8 + $0xa8] ss:$16 sps:$4 sm:$0xff]   ;;  %v2064_v52 = vld [vmem:[%s2347_s8 + $0xcc] ss:$16 sps:$4 sm:$0xff]   ;;  %v2063_v53 = vld [vmem:[%s2347_s8 + $0xc0] ss:$16 sps:$4 sm:$0xff]  }
  0x22   : > { %1840 = vmatprep.subr.bf16.mxu0 %v2015_v16  ;;  %v2067_v54 = vld [vmem:[%s2347_s8 + $0xe4] ss:$16 sps:$4 sm:$0xff]   ;;  %v2066_v55 = vld [vmem:[%s2347_s8 + $0xc8] ss:$16 sps:$4 sm:$0xff]   ;;  %v2070_v56 = vld [vmem:[%s2347_s8 + $0xec] ss:$16 sps:$4 sm:$0xff]  }
  0x23   : > { %v2069_v57 = vld [vmem:[%s2347_s8 + $0xe0] ss:$16 sps:$4 sm:$0xff]   ;;  %v2073_v58 = vld [vmem:[%s2347_s8 + $0x104] ss:$16 sps:$4 sm:$0xff]   ;;  %v2072_v59 = vld [vmem:[%s2347_s8 + $0xe8] ss:$16 sps:$4 sm:$0xff]  }
  0x24   : > { %1013 = vmatpush1.bf16.msra.mxu1 %v2016_v17  ;;  %v2076_v60 = vld [vmem:[%s2347_s8 + $0x10c] ss:$16 sps:$4 sm:$0xff]   ;;  %v2075_v61 = vld [vmem:[%s2347_s8 + $0x100] ss:$16 sps:$4 sm:$0xff]   ;;  %v2079_v62 = vld [vmem:[%s2347_s8 + $0x124] ss:$16 sps:$4 sm:$0xff]  }
  0x25   : > { %1841 = vmatpush3.bf16.msra.mxu0 %v2017_v18  ;;  %1014 = vmatprep.subr.bf16.mxu1 %v2201_v1  ;;  %v2078_v63 = vld [vmem:[%s2347_s8 + $0x108] ss:$16 sps:$4 sm:$0xff]   ;;  %v2082_v0 = vld [vmem:[%s2347_s8 + $0x12c] ss:$16 sps:$4 sm:$0xff]   ;;  %v2085_v2 = vld [vmem:[%s2347_s8 + $0x144] ss:$16 sps:$4 sm:$0xff]  }
  0x26   : > { %1842 = vmatprep.subr.bf16.mxu0 %v2018_v19  ;;  %v2084_v3 = vld [vmem:[%s2347_s8 + $0x128] ss:$16 sps:$4 sm:$0xff]   ;;  %v2088_v4 = vld [vmem:[%s2347_s8 + $0x14c] ss:$16 sps:$4 sm:$0xff]   ;;  %v2087_v5 = vld [vmem:[%s2347_s8 + $0x140] ss:$16 sps:$4 sm:$0xff]  }
  0x27   : > { %v2091_v6 = vld [vmem:[%s2347_s8 + $0x164] ss:$16 sps:$4 sm:$0xff]   ;;  %v2090_v7 = vld [vmem:[%s2347_s8 + $0x148] ss:$16 sps:$4 sm:$0xff]   ;;  %v2094_v8 = vld [vmem:[%s2347_s8 + $0x16c] ss:$16 sps:$4 sm:$0xff]  }
  0x28   : > { %1015 = vmatpush1.bf16.msra.mxu1 %v2019_v20  ;;  %v2093_v9 = vld [vmem:[%s2347_s8 + $0x160] ss:$16 sps:$4 sm:$0xff]   ;;  %v2097_v10 = vld [vmem:[%s2347_s8 + $0x184] ss:$16 sps:$4 sm:$0xff]   ;;  %v2096_v11 = vld [vmem:[%s2347_s8 + $0x168] ss:$16 sps:$4 sm:$0xff]  }
  0x29   : > { %1843 = vmatpush3.bf16.msra.mxu0 %v2020_v21  ;;  %1016 = vmatprep.subr.bf16.mxu1 %v2201_v1  ;;  %v2100_v12 = vld [vmem:[%s2347_s8 + $0x18c] ss:$16 sps:$4 sm:$0xff]   ;;  %v2099_v13 = vld [vmem:[%s2347_s8 + $0x180] ss:$16 sps:$4 sm:$0xff]   ;;  %v2103_v14 = vld [vmem:[%s2347_s8 + $0x1a4] ss:$16 sps:$4 sm:$0xff]  }
  0x2a   : > { %1844 = vmatprep.subr.bf16.mxu0 %v2021_v22  ;;  %v2102_v15 = vld [vmem:[%s2347_s8 + $0x188] ss:$16 sps:$4 sm:$0xff]   ;;  %v2106_v16 = vld [vmem:[%s2347_s8 + $0x1ac] ss:$16 sps:$4 sm:$0xff]   ;;  %v2105_v17 = vld [vmem:[%s2347_s8 + $0x1a0] ss:$16 sps:$4 sm:$0xff]  }
  0x2b   : > { %v2109_v18 = vld [vmem:[%s2347_s8 + $0x1c4] ss:$16 sps:$4 sm:$0xff]   ;;  %v2108_v19 = vld [vmem:[%s2347_s8 + $0x1a8] ss:$16 sps:$4 sm:$0xff]   ;;  %v2112_v20 = vld [vmem:[%s2347_s8 + $0x1cc] ss:$16 sps:$4 sm:$0xff]  }
  0x2c   : > { %1017 = vmatpush1.bf16.msra.mxu1 %v2022_v24  ;;  %v2111_v21 = vld [vmem:[%s2347_s8 + $0x1c0] ss:$16 sps:$4 sm:$0xff]   ;;  %v2115_v22 = vld [vmem:[%s2347_s8 + $0x1e4] ss:$16 sps:$4 sm:$0xff]   ;;  %v2114_v23 = vld [vmem:[%s2347_s8 + $0x1c8] ss:$16 sps:$4 sm:$0xff]  }
  0x2d   : > { %1845 = vmatpush3.bf16.msra.mxu0 %v2023_v26  ;;  %1018 = vmatprep.subr.bf16.mxu1 %v2201_v1  ;;  %v2081_v1 = vld [vmem:[%s2347_s8 + $0x120] ss:$16 sps:$4 sm:$0xff]   ;;  %v2118_v24 = vld [vmem:[%s2347_s8 + $0x1ec] ss:$16 sps:$4 sm:$0xff]   ;;  %v2120_v26 = vld [vmem:[%s2347_s8 + $0x1e8] ss:$16 sps:$4 sm:$0xff]  }
  0x2e   : > { %v2117_v25 = vld [vmem:[%s2347_s8 + $0x1e0] ss:$16 sps:$4 sm:$0xff]   ;;  %s204_s8 = sand.u32 1, %s2183_s13   ;;  %s2127_s29 = scalar_lea.vmem %s2126_s28, 4096 }
  0x2f   : > { %s1553_s27 = sshll.u32 %s204_s8, 7  ;;  %s2556_s23 = scalar_lea.sflag [#allocation3], %s204_s8 }
  0x30   : > { %874 = vmatmul.mubr.bf16.vlgmr.msra.gmra.mrb[0].mxu0 %v2024_v28  ;;  %1019 = vmatpush1.bf16.msra.mxu1 %v839_v29  ;;  %s2468_s9 = scalar_lea.vmem [#allocation2], %s1553_s27 }
  0x31   : > { %881 = vmatprep.mubr.bf16.mxu0 %v2031_v30  ;;  %s1444_s11 = sshll.u32 %s2468_s9, 4  ;;  %s2551_s11 = int_to_ptr.vmem [resolvable:$true] %s1444_s11 }
  0x32   : > { %s2121_s26 = scalar_lea.vmem %s2551_s11, 2048  ;;  %p2128_p1 = scmp.lt.s32.totalorder %s2551_s11, %s2126_s28 }
  0x33   : > { %1035 = vmatmul.mubr.bf16.vlgmr.msra.gmra.mrb[0].mxu1 %v2028_v31  ;;  %p2122_p12 = scmp.ne.s32.totalorder %s2551_s11, %s2121_s26  ;;  %p2129_p2 = scmp.lt.s32.totalorder %s2127_s29, %s2121_s26 }
  0x34   : > { %1647 = vmatprep.mubr.msk.bf16.mxu1 %vm788_vm0, %v2034_v32 }
  0x35   : > { %p2123_p13 = pnand %p2122_p12, %p2265_p4  ;;  %p2130_p3 = por %p2129_p2, %p2128_p1 }
  0x37   : > { %p2124_p0 = pneg %p2123_p13 }
  0x38   : > { %882 = vmatmul.mubr.bf16.gmra.mrb[4].mxu0 %v2033_v33  ;;  %v2453_v33 = vld [vmem:[%s2604_s2] ss:$0 sm:$0xff] }
  0x39   : > { %889 = vmatprep.mubr.bf16.mxu0 %v2037_v34  ;;  %p2131_p5 = pnand %p2130_p3, %p2124_p0 }
  0x3b   : > { %1043 = vmatmul.mubr.bf16.gmra.mrb[4].mxu1 %v2036_v35 }
  0x3c   : > { %1648 = vmatprep.mubr.msk.bf16.mxu1 %vm788_vm0, %v2040_v36 }
  0x40   : > { %890 = vmatmul.mubr.bf16.gmra.mrb[8].mxu0 %v2039_v37  ;;  %v2458_v37 = vld [vmem:[%s2604_s2 + $0x1] ss:$0 sm:$0xff] }
  0x41   : > { %897 = vmatprep.mubr.bf16.mxu0 %v2043_v38 }
  0x43   : > { %1051 = vmatmul.mubr.bf16.gmra.mrb[8].mxu1 %v2042_v39 }
  0x44   : > { %1649 = vmatprep.mubr.msk.bf16.mxu1 %vm788_vm0, %v2046_v40 }
  0x48   : > { %898 = vmatmul.mubr.bf16.gmra.mrb[12].mxu0 %v2045_v41 }
  0x49   : > { %905 = vmatprep.mubr.bf16.mxu0 %v2049_v42 }
  0x4b   : > { %1059 = vmatmul.mubr.bf16.gmra.mrb[12].mxu1 %v2048_v43 }
  0x4c   : > { %1650 = vmatprep.mubr.msk.bf16.mxu1 %vm788_vm0, %v2052_v44 }
  0x50   : > { %906 = vmatmul.mubr.bf16.gmra.mrb[16].mxu0 %v2051_v45 }
  0x51   : > { %913 = vmatprep.mubr.bf16.mxu0 %v2055_v46 }
  0x53   : > { %1067 = vmatmul.mubr.bf16.gmra.mrb[16].mxu1 %v2054_v47 }
  0x54   : > { %1651 = vmatprep.mubr.msk.bf16.mxu1 %vm788_vm0, %v2058_v48 }
  0x58   : > { %914 = vmatmul.mubr.bf16.gmra.mrb[20].mxu0 %v2057_v49 }
  0x59   : > { %921 = vmatprep.mubr.bf16.mxu0 %v2061_v50 }
  0x5b   : > { %1075 = vmatmul.mubr.bf16.gmra.mrb[20].mxu1 %v2060_v51 }
  0x5c   : > { %1652 = vmatprep.mubr.msk.bf16.mxu1 %vm788_vm0, %v2064_v52 }
  0x60   : > { %922 = vmatmul.mubr.bf16.gmra.mrb[24].mxu0 %v2063_v53 }
  0x61   : > { %929 = vmatprep.mubr.bf16.mxu0 %v2067_v54 }
  0x63   : > { %1083 = vmatmul.mubr.bf16.gmra.mrb[24].mxu1 %v2066_v55 }
  0x64   : > { %1653 = vmatprep.mubr.msk.bf16.mxu1 %vm788_vm0, %v2070_v56 }
  0x68   : > { %930 = vmatmul.mubr.bf16.gmra.mrb[28].mxu0 %v2069_v57 }
  0x69   : > { %937 = vmatprep.mubr.bf16.mxu0 %v2073_v58 }
  0x6b   : > { %1091 = vmatmul.mubr.bf16.gmra.mrb[28].mxu1 %v2072_v59 }
  0x6c   : > { %1654 = vmatprep.mubr.msk.bf16.mxu1 %vm788_vm0, %v2076_v60 }
  0x70   : > { %938 = vmatmul.mubr.bf16.gmra.mrb[32].mxu0 %v2075_v61 }
  0x71   : > { %945 = vmatprep.mubr.bf16.mxu0 %v2079_v62 }
  0x73   : > { %1099 = vmatmul.mubr.bf16.gmra.mrb[32].mxu1 %v2078_v63 }
  0x74   : > { %1655 = vmatprep.mubr.msk.bf16.mxu1 %vm788_vm0, %v2082_v0 }
  0x78   : > { %946 = vmatmul.mubr.bf16.gmra.mrb[36].mxu0 %v2081_v1 }
  0x79   : > { %953 = vmatprep.mubr.bf16.mxu0 %v2085_v2 }
  0x7b   : > { %1107 = vmatmul.mubr.bf16.gmra.mrb[36].mxu1 %v2084_v3 }
  0x7c   : > { %1656 = vmatprep.mubr.msk.bf16.mxu1 %vm788_vm0, %v2088_v4 }
  0x80   : > { %954 = vmatmul.mubr.bf16.gmra.mrb[40].mxu0 %v2087_v5 }
  0x81   : > { %961 = vmatprep.mubr.bf16.mxu0 %v2091_v6 }
  0x83   : > { %1115 = vmatmul.mubr.bf16.gmra.mrb[40].mxu1 %v2090_v7 }
  0x84   : > { %1657 = vmatprep.mubr.msk.bf16.mxu1 %vm788_vm0, %v2094_v8 }
  0x88   : > { %962 = vmatmul.mubr.bf16.gmra.mrb[44].mxu0 %v2093_v9 }
  0x89   : > { %969 = vmatprep.mubr.bf16.mxu0 %v2097_v10 }
  0x8b   : > { %1123 = vmatmul.mubr.bf16.gmra.mrb[44].mxu1 %v2096_v11 }
  0x8c   : > { %1658 = vmatprep.mubr.msk.bf16.mxu1 %vm788_vm0, %v2100_v12 }
  0x90   : > { %970 = vmatmul.mubr.bf16.gmra.mrb[48].mxu0 %v2099_v13 }
  0x91   : > { %977 = vmatprep.mubr.bf16.mxu0 %v2103_v14 }
  0x93   : > { %1131 = vmatmul.mubr.bf16.gmra.mrb[48].mxu1 %v2102_v15 }
  0x94   : > { %1659 = vmatprep.mubr.msk.bf16.mxu1 %vm788_vm0, %v2106_v16 }
  0x98   : > { %978 = vmatmul.mubr.bf16.gmra.mrb[52].mxu0 %v2105_v17 }
  0x99   : > { %985 = vmatprep.mubr.bf16.mxu0 %v2109_v18 }
  0x9b   : > { %1139 = vmatmul.mubr.bf16.gmra.mrb[52].mxu1 %v2108_v19 }
  0x9c   : > { %1660 = vmatprep.mubr.msk.bf16.mxu1 %vm788_vm0, %v2112_v20 }
  0xa0   : > { %986 = vmatmul.mubr.bf16.gmra.mrb[56].mxu0 %v2111_v21 }
  0xa1   : > { %993 = vmatprep.mubr.bf16.mxu0 %v2115_v22 }
  0xa3   : > { %1147 = vmatmul.mubr.bf16.gmra.mrb[56].mxu1 %v2114_v23 }
  0xa4   : > { %1661 = vmatprep.mubr.msk.bf16.mxu1 %vm788_vm0, %v2118_v24 }
  0xa8   : > { %994 = vmatmul.mubr.bf16.gmra.mrb[60].mxu0 %v2117_v25 }
  0xab   : > { %1155 = vmatmul.mubr.bf16.gmra.mrb[60].mxu1 %v2120_v26 }
 0x103   : > { %v1846_v27 = vpop.f32.mrb[0].mxu0 }
 0x104   : > { %v1847_v28 = vpop.f32.mrb[1].mxu0 }
 0x105   : > { %v1848_v29 = vadd.f32 %v1847_v28, %v1846_v27  ;;  %v1849_v30 = vpop.f32.mrb[2].mxu0 }
 0x106   : > { %v1850_v31 = vpop.f32.mrb[3].mxu0  ;;  %v1036_v32 = vpop.f32.mrb[0].mxu1 }
 0x107   : > { %v1851_v34 = vadd.f32 %v1850_v31, %v1849_v30  ;;  %v1037_v35 = vadd.f32 %v1848_v29, %v1036_v32  ;;  %v1038_v36 = vpop.f32.mrb[1].mxu1 }
 0x108   : > { %v1039_v38 = vpop.f32.mrb[2].mxu1 }
 0x109   : > { %v1168_v39 = vmul.f32 %v2453_v33, %v1037_v35  ;;  %v1040_v40 = vadd.f32 %v1851_v34, %v1039_v38  ;;  %v1041_v41 = vpop.f32.mrb[3].mxu1 }
 0x10b   : > { %v1205_v42 = vadd.f32 %v2458_v37, %v1168_v39  ;;  %v1169_v43 = vmul.f32 %v2453_v33, %v1040_v40  ;;  %v1852_v44 = vpop.f32.mrb[4].mxu0 }
 0x10c   : > { %v1853_v45 = vpop.f32.mrb[5].mxu0 }
 0x10d   : > { %v1206_v46 = vadd.f32 %v2458_v37, %v1169_v43  ;;  %v1854_v47 = vadd.f32 %v1853_v45, %v1852_v44  ;;  %v1855_v48 = vpop.f32.mrb[6].mxu0  ;;  %v1237_v51 = vmax.f32 %v1205_v42, 0.0 }
 0x10e   : > { %v1856_v49 = vpop.f32.mrb[7].mxu0  ;;  %v1044_v50 = vpop.f32.mrb[4].mxu1 }
 0x10f   : > { %v1238_v52 = vmax.f32 %v1206_v46, 0.0  ;;  %v1857_v53 = vadd.f32 %v1856_v49, %v1855_v48  ;;  %v1045_v54 = vadd.f32 %v1854_v47, %v1044_v50  ;;  %v1046_v55 = vpop.f32.mrb[5].mxu1 }
 0x110   : > { %v1047_v56 = vpop.f32.mrb[6].mxu1 }
 0x111   : > { %v1738_v57 = vpack.c.bf16 %v1238_v52, %v1237_v51  ;;  %v1170_v58 = vmul.f32 %v2453_v33, %v1045_v54  ;;  %v1048_v59 = vadd.f32 %v1857_v53, %v1047_v56  ;;  %v1049_v60 = vpop.f32.mrb[7].mxu1 }
 0x113   : > { %1739 = vst [vmem:[%s2468_s9] sm:$0xff] %v1738_v57   ;;  %v1207_v61 = vadd.f32 %v2458_v37, %v1170_v58  ;;  %v1171_v62 = vmul.f32 %v2453_v33, %v1048_v59  ;;  %v1858_v63 = vpop.f32.mrb[8].mxu0 }
 0x114   : > { %v1859_v0 = vpop.f32.mrb[9].mxu0 }
 0x115   : > { %v1208_v1 = vadd.f32 %v2458_v37, %v1171_v62  ;;  %v1860_v2 = vadd.f32 %v1859_v0, %v1858_v63  ;;  %v1861_v3 = vpop.f32.mrb[10].mxu0  ;;  %v1239_v6 = vmax.f32 %v1207_v61, 0.0 }
 0x116   : > { %v1862_v4 = vpop.f32.mrb[11].mxu0  ;;  %v1052_v5 = vpop.f32.mrb[8].mxu1 }
 0x117   : > { %v1240_v7 = vmax.f32 %v1208_v1, 0.0  ;;  %v1863_v8 = vadd.f32 %v1862_v4, %v1861_v3  ;;  %v1053_v9 = vadd.f32 %v1860_v2, %v1052_v5  ;;  %v1054_v10 = vpop.f32.mrb[9].mxu1 }
 0x118   : > { %v1055_v11 = vpop.f32.mrb[10].mxu1 }
 0x119   : > { %v1743_v12 = vpack.c.bf16 %v1240_v7, %v1239_v6  ;;  %v1172_v13 = vmul.f32 %v2453_v33, %v1053_v9  ;;  %v1056_v14 = vadd.f32 %v1863_v8, %v1055_v11  ;;  %v1057_v15 = vpop.f32.mrb[11].mxu1 }
 0x11b   : > { %1815 = vst [vmem:[%s2468_s9 + $0x8] sm:$0xff] %v1743_v12   ;;  %v1209_v16 = vadd.f32 %v2458_v37, %v1172_v13  ;;  %v1173_v17 = vmul.f32 %v2453_v33, %v1056_v14  ;;  %v1864_v18 = vpop.f32.mrb[12].mxu0 }
 0x11c   : > { %v1865_v19 = vpop.f32.mrb[13].mxu0 }
 0x11d   : > { %v1210_v20 = vadd.f32 %v2458_v37, %v1173_v17  ;;  %v1866_v21 = vadd.f32 %v1865_v19, %v1864_v18  ;;  %v1867_v22 = vpop.f32.mrb[14].mxu0  ;;  %v1241_v25 = vmax.f32 %v1209_v16, 0.0 }
 0x11e   : > { %v1868_v23 = vpop.f32.mrb[15].mxu0  ;;  %v1060_v24 = vpop.f32.mrb[12].mxu1 }
 0x11f   : > { %v1242_v26 = vmax.f32 %v1210_v20, 0.0  ;;  %v1869_v27 = vadd.f32 %v1868_v23, %v1867_v22  ;;  %v1061_v28 = vadd.f32 %v1866_v21, %v1060_v24  ;;  %v1062_v29 = vpop.f32.mrb[13].mxu1 }
 0x120   : > { %v1063_v30 = vpop.f32.mrb[14].mxu1 }
 0x121   : > { %v1748_v31 = vpack.c.bf16 %v1242_v26, %v1241_v25  ;;  %v1174_v32 = vmul.f32 %v2453_v33, %v1061_v28  ;;  %v1064_v34 = vadd.f32 %v1869_v27, %v1063_v30  ;;  %v1065_v35 = vpop.f32.mrb[15].mxu1 }
 0x123   : > { %1816 = vst [vmem:[%s2468_s9 + $0x10] sm:$0xff] %v1748_v31   ;;  %v1211_v36 = vadd.f32 %v2458_v37, %v1174_v32  ;;  %v1175_v38 = vmul.f32 %v2453_v33, %v1064_v34  ;;  %v1870_v39 = vpop.f32.mrb[16].mxu0 }
 0x124   : > { %v1871_v40 = vpop.f32.mrb[17].mxu0 }
 0x125   : > { %v1212_v41 = vadd.f32 %v2458_v37, %v1175_v38  ;;  %v1872_v42 = vadd.f32 %v1871_v40, %v1870_v39  ;;  %v1873_v43 = vpop.f32.mrb[18].mxu0  ;;  %v1243_v46 = vmax.f32 %v1211_v36, 0.0 }
 0x126   : > { %v1874_v44 = vpop.f32.mrb[19].mxu0  ;;  %v1068_v45 = vpop.f32.mrb[16].mxu1 }
 0x127   : > { %v1244_v47 = vmax.f32 %v1212_v41, 0.0  ;;  %v1875_v48 = vadd.f32 %v1874_v44, %v1873_v43  ;;  %v1069_v49 = vadd.f32 %v1872_v42, %v1068_v45  ;;  %v1070_v50 = vpop.f32.mrb[17].mxu1 }
 0x128   : > { %v1071_v51 = vpop.f32.mrb[18].mxu1 }
 0x129   : > { %v1753_v52 = vpack.c.bf16 %v1244_v47, %v1243_v46  ;;  %v1176_v53 = vmul.f32 %v2453_v33, %v1069_v49  ;;  %v1072_v54 = vadd.f32 %v1875_v48, %v1071_v51  ;;  %v1073_v55 = vpop.f32.mrb[19].mxu1 }
 0x12b   : > { %1817 = vst [vmem:[%s2468_s9 + $0x18] sm:$0xff] %v1753_v52   ;;  %v1213_v56 = vadd.f32 %v2458_v37, %v1176_v53  ;;  %v1177_v57 = vmul.f32 %v2453_v33, %v1072_v54  ;;  %v1876_v58 = vpop.f32.mrb[20].mxu0 }
 0x12c   : > { %v1877_v59 = vpop.f32.mrb[21].mxu0 }
 0x12d   : > { %v1214_v60 = vadd.f32 %v2458_v37, %v1177_v57  ;;  %v1878_v61 = vadd.f32 %v1877_v59, %v1876_v58  ;;  %v1879_v62 = vpop.f32.mrb[22].mxu0  ;;  %v1245_v1 = vmax.f32 %v1213_v56, 0.0 }
 0x12e   : > { %v1880_v63 = vpop.f32.mrb[23].mxu0  ;;  %v1076_v0 = vpop.f32.mrb[20].mxu1 }
 0x12f   : > { %v1246_v2 = vmax.f32 %v1214_v60, 0.0  ;;  %v1881_v3 = vadd.f32 %v1880_v63, %v1879_v62  ;;  %v1077_v4 = vadd.f32 %v1878_v61, %v1076_v0  ;;  %v1078_v5 = vpop.f32.mrb[21].mxu1 }
 0x130   : > { %v1079_v6 = vpop.f32.mrb[22].mxu1 }
 0x131   : > { %v1758_v7 = vpack.c.bf16 %v1246_v2, %v1245_v1  ;;  %v1178_v8 = vmul.f32 %v2453_v33, %v1077_v4  ;;  %v1080_v9 = vadd.f32 %v1881_v3, %v1079_v6  ;;  %v1081_v10 = vpop.f32.mrb[23].mxu1 }
 0x133   : > { %1818 = vst [vmem:[%s2468_s9 + $0x20] sm:$0xff] %v1758_v7   ;;  %v1215_v11 = vadd.f32 %v2458_v37, %v1178_v8  ;;  %v1179_v12 = vmul.f32 %v2453_v33, %v1080_v9  ;;  %v1882_v13 = vpop.f32.mrb[24].mxu0 }
 0x134   : > { %v1883_v14 = vpop.f32.mrb[25].mxu0 }
 0x135   : > { %v1216_v15 = vadd.f32 %v2458_v37, %v1179_v12  ;;  %v1884_v16 = vadd.f32 %v1883_v14, %v1882_v13  ;;  %v1885_v17 = vpop.f32.mrb[26].mxu0  ;;  %v1247_v20 = vmax.f32 %v1215_v11, 0.0 }
 0x136   : > { %v1886_v18 = vpop.f32.mrb[27].mxu0  ;;  %v1084_v19 = vpop.f32.mrb[24].mxu1 }
 0x137   : > { %v1248_v21 = vmax.f32 %v1216_v15, 0.0  ;;  %v1887_v22 = vadd.f32 %v1886_v18, %v1885_v17  ;;  %v1085_v23 = vadd.f32 %v1884_v16, %v1084_v19  ;;  %v1086_v24 = vpop.f32.mrb[25].mxu1 }
 0x138   : > { %v1087_v25 = vpop.f32.mrb[26].mxu1 }
 0x139   : > { %v1763_v26 = vpack.c.bf16 %v1248_v21, %v1247_v20  ;;  %v1180_v27 = vmul.f32 %v2453_v33, %v1085_v23  ;;  %v1088_v28 = vadd.f32 %v1887_v22, %v1087_v25  ;;  %v1089_v29 = vpop.f32.mrb[27].mxu1 }
 0x13b   : > { %1819 = vst [vmem:[%s2468_s9 + $0x28] sm:$0xff] %v1763_v26   ;;  %v1217_v30 = vadd.f32 %v2458_v37, %v1180_v27  ;;  %v1181_v31 = vmul.f32 %v2453_v33, %v1088_v28  ;;  %v1888_v32 = vpop.f32.mrb[28].mxu0 }
 0x13c   : > { %v1889_v34 = vpop.f32.mrb[29].mxu0 }
 0x13d   : > { %v1218_v35 = vadd.f32 %v2458_v37, %v1181_v31  ;;  %v1890_v36 = vadd.f32 %v1889_v34, %v1888_v32  ;;  %v1891_v38 = vpop.f32.mrb[30].mxu0  ;;  %v1249_v41 = vmax.f32 %v1217_v30, 0.0 }
 0x13e   : > { %v1892_v39 = vpop.f32.mrb[31].mxu0  ;;  %v1092_v40 = vpop.f32.mrb[28].mxu1 }
 0x13f   : > { %v1250_v42 = vmax.f32 %v1218_v35, 0.0  ;;  %v1893_v43 = vadd.f32 %v1892_v39, %v1891_v38  ;;  %v1093_v44 = vadd.f32 %v1890_v36, %v1092_v40  ;;  %v1094_v45 = vpop.f32.mrb[29].mxu1 }
 0x140   : > { %v1095_v46 = vpop.f32.mrb[30].mxu1 }
 0x141   : > { %v1768_v47 = vpack.c.bf16 %v1250_v42, %v1249_v41  ;;  %v1182_v48 = vmul.f32 %v2453_v33, %v1093_v44  ;;  %v1096_v49 = vadd.f32 %v1893_v43, %v1095_v46  ;;  %v1097_v50 = vpop.f32.mrb[31].mxu1 }
 0x143   : > { %1820 = vst [vmem:[%s2468_s9 + $0x30] sm:$0xff] %v1768_v47   ;;  %v1219_v51 = vadd.f32 %v2458_v37, %v1182_v48  ;;  %v1183_v52 = vmul.f32 %v2453_v33, %v1096_v49  ;;  %v1894_v53 = vpop.f32.mrb[32].mxu0 }
 0x144   : > { %v1895_v54 = vpop.f32.mrb[33].mxu0 }
 0x145   : > { %v1220_v55 = vadd.f32 %v2458_v37, %v1183_v52  ;;  %v1896_v56 = vadd.f32 %v1895_v54, %v1894_v53  ;;  %v1897_v57 = vpop.f32.mrb[34].mxu0  ;;  %v1251_v60 = vmax.f32 %v1219_v51, 0.0 }
 0x146   : > { %v1898_v58 = vpop.f32.mrb[35].mxu0  ;;  %v1100_v59 = vpop.f32.mrb[32].mxu1 }
 0x147   : > { %v1252_v61 = vmax.f32 %v1220_v55, 0.0  ;;  %v1899_v62 = vadd.f32 %v1898_v58, %v1897_v57  ;;  %v1101_v63 = vadd.f32 %v1896_v56, %v1100_v59  ;;  %v1102_v0 = vpop.f32.mrb[33].mxu1 }
 0x148   : > { %v1103_v1 = vpop.f32.mrb[34].mxu1 }
 0x149   : > { %v1773_v2 = vpack.c.bf16 %v1252_v61, %v1251_v60  ;;  %v1184_v3 = vmul.f32 %v2453_v33, %v1101_v63  ;;  %v1104_v4 = vadd.f32 %v1899_v62, %v1103_v1  ;;  %v1105_v5 = vpop.f32.mrb[35].mxu1 }
 0x14b   : > { %1821 = vst [vmem:[%s2468_s9 + $0x38] sm:$0xff] %v1773_v2   ;;  %v1221_v6 = vadd.f32 %v2458_v37, %v1184_v3  ;;  %v1185_v7 = vmul.f32 %v2453_v33, %v1104_v4  ;;  %v1900_v8 = vpop.f32.mrb[36].mxu0 }
 0x14c   : > { %v1901_v9 = vpop.f32.mrb[37].mxu0 }
 0x14d   : > { %v1222_v10 = vadd.f32 %v2458_v37, %v1185_v7  ;;  %v1902_v11 = vadd.f32 %v1901_v9, %v1900_v8  ;;  %v1903_v12 = vpop.f32.mrb[38].mxu0  ;;  %v1253_v15 = vmax.f32 %v1221_v6, 0.0 }
 0x14e   : > { %v1904_v13 = vpop.f32.mrb[39].mxu0  ;;  %v1108_v14 = vpop.f32.mrb[36].mxu1 }
 0x14f   : > { %v1254_v16 = vmax.f32 %v1222_v10, 0.0  ;;  %v1905_v17 = vadd.f32 %v1904_v13, %v1903_v12  ;;  %v1109_v18 = vadd.f32 %v1902_v11, %v1108_v14  ;;  %v1110_v19 = vpop.f32.mrb[37].mxu1 }
 0x150   : > { %v1111_v20 = vpop.f32.mrb[38].mxu1 }
 0x151   : > { %v1778_v21 = vpack.c.bf16 %v1254_v16, %v1253_v15  ;;  %v1186_v22 = vmul.f32 %v2453_v33, %v1109_v18  ;;  %v1112_v23 = vadd.f32 %v1905_v17, %v1111_v20  ;;  %v1113_v24 = vpop.f32.mrb[39].mxu1 }
 0x153   : > { %1822 = vst [vmem:[%s2468_s9 + $0x40] sm:$0xff] %v1778_v21   ;;  %v1223_v25 = vadd.f32 %v2458_v37, %v1186_v22  ;;  %v1187_v26 = vmul.f32 %v2453_v33, %v1112_v23  ;;  %v1906_v27 = vpop.f32.mrb[40].mxu0 }
 0x154   : > { %v1907_v28 = vpop.f32.mrb[41].mxu0 }
 0x155   : > { %v1224_v29 = vadd.f32 %v2458_v37, %v1187_v26  ;;  %v1908_v30 = vadd.f32 %v1907_v28, %v1906_v27  ;;  %v1909_v31 = vpop.f32.mrb[42].mxu0  ;;  %v1255_v35 = vmax.f32 %v1223_v25, 0.0 }
 0x156   : > { %v1910_v32 = vpop.f32.mrb[43].mxu0  ;;  %v1116_v34 = vpop.f32.mrb[40].mxu1 }
 0x157   : > { %v1256_v36 = vmax.f32 %v1224_v29, 0.0  ;;  %v1911_v38 = vadd.f32 %v1910_v32, %v1909_v31  ;;  %v1117_v39 = vadd.f32 %v1908_v30, %v1116_v34  ;;  %v1118_v40 = vpop.f32.mrb[41].mxu1 }
 0x158   : > { %v1119_v41 = vpop.f32.mrb[42].mxu1 }
 0x159   : > { %v1783_v42 = vpack.c.bf16 %v1256_v36, %v1255_v35  ;;  %v1188_v43 = vmul.f32 %v2453_v33, %v1117_v39  ;;  %v1120_v44 = vadd.f32 %v1911_v38, %v1119_v41  ;;  %v1121_v45 = vpop.f32.mrb[43].mxu1 }
 0x15b   : > { %1823 = vst [vmem:[%s2468_s9 + $0x48] sm:$0xff] %v1783_v42   ;;  %v1225_v46 = vadd.f32 %v2458_v37, %v1188_v43  ;;  %v1189_v47 = vmul.f32 %v2453_v33, %v1120_v44  ;;  %v1912_v48 = vpop.f32.mrb[44].mxu0 }
 0x15c   : > { %v1913_v49 = vpop.f32.mrb[45].mxu0 }
 0x15d   : > { %v1226_v50 = vadd.f32 %v2458_v37, %v1189_v47  ;;  %v1914_v51 = vadd.f32 %v1913_v49, %v1912_v48  ;;  %v1915_v52 = vpop.f32.mrb[46].mxu0  ;;  %v1257_v55 = vmax.f32 %v1225_v46, 0.0 }
 0x15e   : > { %v1916_v53 = vpop.f32.mrb[47].mxu0  ;;  %v1124_v54 = vpop.f32.mrb[44].mxu1 }
 0x15f   : > { %v1258_v56 = vmax.f32 %v1226_v50, 0.0  ;;  %v1917_v57 = vadd.f32 %v1916_v53, %v1915_v52  ;;  %v1125_v58 = vadd.f32 %v1914_v51, %v1124_v54  ;;  %v1126_v59 = vpop.f32.mrb[45].mxu1 }
 0x160   : > { %v1127_v60 = vpop.f32.mrb[46].mxu1 }
 0x161   : > { %v1788_v61 = vpack.c.bf16 %v1258_v56, %v1257_v55  ;;  %v1190_v62 = vmul.f32 %v2453_v33, %v1125_v58  ;;  %v1128_v63 = vadd.f32 %v1917_v57, %v1127_v60  ;;  %v1129_v0 = vpop.f32.mrb[47].mxu1 }
 0x163   : > { %1824 = vst [vmem:[%s2468_s9 + $0x50] sm:$0xff] %v1788_v61   ;;  %v1227_v1 = vadd.f32 %v2458_v37, %v1190_v62  ;;  %v1191_v2 = vmul.f32 %v2453_v33, %v1128_v63  ;;  %v1918_v3 = vpop.f32.mrb[48].mxu0 }
 0x164   : > { %v1919_v4 = vpop.f32.mrb[49].mxu0 }
 0x165   : > { %v1228_v5 = vadd.f32 %v2458_v37, %v1191_v2  ;;  %v1920_v6 = vadd.f32 %v1919_v4, %v1918_v3  ;;  %v1921_v7 = vpop.f32.mrb[50].mxu0  ;;  %v1259_v10 = vmax.f32 %v1227_v1, 0.0 }
 0x166   : > { %v1922_v8 = vpop.f32.mrb[51].mxu0  ;;  %v1132_v9 = vpop.f32.mrb[48].mxu1 }
 0x167   : > { %v1260_v11 = vmax.f32 %v1228_v5, 0.0  ;;  %v1923_v12 = vadd.f32 %v1922_v8, %v1921_v7  ;;  %v1133_v13 = vadd.f32 %v1920_v6, %v1132_v9  ;;  %v1134_v14 = vpop.f32.mrb[49].mxu1 }
 0x168   : > { %v1135_v15 = vpop.f32.mrb[50].mxu1 }
 0x169   : > { %v1793_v16 = vpack.c.bf16 %v1260_v11, %v1259_v10  ;;  %v1192_v17 = vmul.f32 %v2453_v33, %v1133_v13  ;;  %v1136_v18 = vadd.f32 %v1923_v12, %v1135_v15  ;;  %v1137_v19 = vpop.f32.mrb[51].mxu1 }
 0x16b   : > { %1825 = vst [vmem:[%s2468_s9 + $0x58] sm:$0xff] %v1793_v16   ;;  %v1229_v20 = vadd.f32 %v2458_v37, %v1192_v17  ;;  %v1193_v21 = vmul.f32 %v2453_v33, %v1136_v18  ;;  %v1924_v22 = vpop.f32.mrb[52].mxu0 }
 0x16c   : > { %v1925_v23 = vpop.f32.mrb[53].mxu0 }
 0x16d   : > { %v1230_v24 = vadd.f32 %v2458_v37, %v1193_v21  ;;  %v1926_v25 = vadd.f32 %v1925_v23, %v1924_v22  ;;  %v1927_v26 = vpop.f32.mrb[54].mxu0  ;;  %v1261_v29 = vmax.f32 %v1229_v20, 0.0 }
 0x16e   : > { %v1928_v27 = vpop.f32.mrb[55].mxu0  ;;  %v1140_v28 = vpop.f32.mrb[52].mxu1 }
 0x16f   : > { %v1262_v30 = vmax.f32 %v1230_v24, 0.0  ;;  %v1929_v31 = vadd.f32 %v1928_v27, %v1927_v26  ;;  %v1141_v32 = vadd.f32 %v1926_v25, %v1140_v28  ;;  %v1142_v34 = vpop.f32.mrb[53].mxu1 }
 0x170   : > { %v1143_v35 = vpop.f32.mrb[54].mxu1 }
 0x171   : > { %v1798_v36 = vpack.c.bf16 %v1262_v30, %v1261_v29  ;;  %v1194_v38 = vmul.f32 %v2453_v33, %v1141_v32  ;;  %v1144_v39 = vadd.f32 %v1929_v31, %v1143_v35  ;;  %v1145_v40 = vpop.f32.mrb[55].mxu1 }
 0x173   : > { %1826 = vst [vmem:[%s2468_s9 + $0x60] sm:$0xff] %v1798_v36   ;;  %v1231_v41 = vadd.f32 %v2458_v37, %v1194_v38  ;;  %v1195_v42 = vmul.f32 %v2453_v33, %v1144_v39  ;;  %v1930_v43 = vpop.f32.mrb[56].mxu0 }
 0x174   : > { %v1931_v44 = vpop.f32.mrb[57].mxu0 }
 0x175   : > { %v1232_v45 = vadd.f32 %v2458_v37, %v1195_v42  ;;  %v1932_v46 = vadd.f32 %v1931_v44, %v1930_v43  ;;  %v1933_v47 = vpop.f32.mrb[58].mxu0  ;;  %v1263_v50 = vmax.f32 %v1231_v41, 0.0 }
 0x176   : > { %v1934_v48 = vpop.f32.mrb[59].mxu0  ;;  %v1148_v49 = vpop.f32.mrb[56].mxu1 }
 0x177   : > { %v1264_v51 = vmax.f32 %v1232_v45, 0.0  ;;  %v1935_v52 = vadd.f32 %v1934_v48, %v1933_v47  ;;  %v1149_v53 = vadd.f32 %v1932_v46, %v1148_v49  ;;  %v1150_v54 = vpop.f32.mrb[57].mxu1 }
 0x178   : > { %v1151_v55 = vpop.f32.mrb[58].mxu1 }
 0x179   : > { %v1803_v56 = vpack.c.bf16 %v1264_v51, %v1263_v50  ;;  %v1196_v57 = vmul.f32 %v2453_v33, %v1149_v53  ;;  %v1152_v58 = vadd.f32 %v1935_v52, %v1151_v55  ;;  %v1153_v59 = vpop.f32.mrb[59].mxu1 }
 0x17b   : > { %1827 = vst [vmem:[%s2468_s9 + $0x68] sm:$0xff] %v1803_v56   ;;  %v1233_v60 = vadd.f32 %v2458_v37, %v1196_v57  ;;  %v1197_v61 = vmul.f32 %v2453_v33, %v1152_v58  ;;  %v1936_v62 = vpop.f32.mrb[60].mxu0 }
 0x17c   : > { %v1937_v63 = vpop.f32.mrb[61].mxu0 }
 0x17d   : > { %v1234_v0 = vadd.f32 %v2458_v37, %v1197_v61  ;;  %v1938_v1 = vadd.f32 %v1937_v63, %v1936_v62  ;;  %v1939_v2 = vpop.f32.mrb[62].mxu0  ;;  %v1265_v5 = vmax.f32 %v1233_v60, 0.0 }
 0x17e   : > { %v1940_v3 = vpop.f32.mrb[63].mxu0  ;;  %v1156_v4 = vpop.f32.mrb[60].mxu1 }
 0x17f   : > { %v1266_v6 = vmax.f32 %v1234_v0, 0.0  ;;  %v1941_v7 = vadd.f32 %v1940_v3, %v1939_v2  ;;  %v1157_v8 = vadd.f32 %v1938_v1, %v1156_v4  ;;  %v1158_v9 = vpop.f32.mrb[61].mxu1 }
 0x180   : > { %v1159_v10 = vpop.f32.mrb[62].mxu1 }
 0x181   : > { %v1808_v11 = vpack.c.bf16 %v1266_v6, %v1265_v5  ;;  %v1198_v12 = vmul.f32 %v2453_v33, %v1157_v8  ;;  %v1160_v13 = vadd.f32 %v1941_v7, %v1159_v10  ;;  %v1161_v14 = vpop.f32.mrb[63].mxu1 }
 0x183   : > { %1828 = vst [vmem:[%s2468_s9 + $0x70] sm:$0xff] %v1808_v11   ;;  %v1235_v15 = vadd.f32 %v2458_v37, %v1198_v12  ;;  %v1199_v16 = vmul.f32 %v2453_v33, %v1160_v13 }
 0x185   : > { %v1236_v17 = vadd.f32 %v2458_v37, %v1199_v16  ;;  %v1267_v18 = vmax.f32 %v1235_v15, 0.0 }
 0x187   : > { %v1268_v19 = vmax.f32 %v1236_v17, 0.0 }
 0x189   : > { %v1813_v20 = vpack.c.bf16 %v1268_v19, %v1267_v18 }
 0x18b   : > { %1829 = vst [vmem:[%s2468_s9 + $0x78] sm:$0xff] %v1813_v20  }
 0x18c   : > { %2134 = shalt.err (!%p2131_p5)
}
 0x18d   : > { %s2135_s30 = scalar_lea.hbm %s2549_s21, 2048  ;;  %s2139_s6 = scalar_lea.hbm %s2605_s3, 8192 }
 0x18e   : > { %p2136_p6 = scmp.ne.s32.totalorder %s2549_s21, %s2135_s30  ;;  %p2140_p10 = scmp.lt.u32.totalorder %s2549_s21, %s2605_s3 }
 0x18f   : > { %p2141_p11 = scmp.lt.u32.totalorder %s2139_s6, %s2135_s30  ;;  %p2143_p13 = scmp.lt.u32.totalorder %s2135_s30, %s2549_s21 }
 0x190   : > { %p2137_p7 = pnand %p2136_p6, %p2265_p4 }
 0x191   : > { %p2142_p12 = por %p2141_p11, %p2140_p10 }
 0x192   : > { %p2138_p9 = pneg %p2137_p7 }
 0x193   : > { %p2144_p0 = por %p2143_p13, %p2142_p12 }
 0x195   : > { %p2145_p1 = pnand %p2144_p0, %p2138_p9 }
 0x197   : > { %2148 = shalt.err (!%p2145_p1)
}
 0x198   : > { %s2203_s27 = smov 64   ;;  %s2204_s9 = smov 4  }
 0x199   : > { %1942 = dma.vmem_to_hbm [thread:$0]  (%p2265_p4), %s2551_s11, 2048, %s2549_s21, %s2556_s23, %s2203_s27, %s2203_s27, %s2204_s9  }
 0x19a PF: > { %p1948_p2 = scmp.ge.s32.totalorder %s2199_s17, 2  ;;  %s1459_s10 = sand.u32 1, %s2179_s12  }
 0x19b   : > { %s1460_s18 = scalar_lea.sflag [#allocation3], %s1459_s10 }
 0x19c   : > { %p1945_p3 = pnand %p1948_p2, %p2272_p8 }
 0x19e   : > { %2174 = dma.done.wait (!%p1945_p3), %s1460_s18, 2048  }
 0x19f   : > { %2176 = vsyncadd (!%p1945_p3), %s1460_s18, 4294965248  ;;  %s16_s17 = sadd.s32 1, %s2199_s17   ;;  %s2608_s12 = smov %s2183_s13 }
 0x1a0   : > { %p13_p5 = scmp.ge.s32.totalorder %s16_s17, 6   ;;  %s2609_s13 = smov %s2187_s14 }
 0x1a1   : > { %s2610_s14 = smov %s2278_s25  ;;  %s2611_s15 = smov %s2195_s16 }
 0x1a2   : > { %s2612_s16 = smov %s2614_s20  ;;  %15 = sbr.rel (!%p13_p5) target bundleno = 4 (0x4), region = 73 }
 0x1a9   :  { %1465 = vsyncpa [#allocation3], 1 }
 0x1aa   :  { %1467 = vsyncpa [#allocation3 + $0x1], 1 }

</bundles_post_ra>
